<compile_context>
chip_gen: v5e
topology: v5e:2x2
jax: 0.10.0
libtpu: 0.0.40
codegen_flags: <defaults>
</compile_context>

<pallas_src>
import functools

import jax
import jax.numpy as jnp
from jax.experimental import pallas as pl
from jax.experimental.pallas import tpu as pltpu


def _cnn_kernel(x_ref, w_ref, b_ref, o_ref, *, kernel_size, l_out, pack):
    # x_ref: (TN, L_pad, C_in)  w_ref: (K*C_in, C_out)  b_ref: (1, C_out)
    # o_ref: (TN // pack, pack * C_out)
    tn = x_ref.shape[0]
    c_in = x_ref.shape[2]
    kc = w_ref.shape[0]          # K * C_in
    c_out = w_ref.shape[1]

    # In-kernel im2col: K static tap slices concatenated along the channel (lane) axis.
    taps = [x_ref[:, k:k + l_out, :] for k in range(kernel_size)]
    cols = jnp.concatenate(taps, axis=-1)                 # (TN, L_out, K*C_in)
    cols2 = cols.reshape(tn * l_out, kc)                  # 2-D LHS for the MXU

    # Single matmul, f32 accumulation (inputs may be bf16).
    acc = jnp.dot(cols2, w_ref[...],
                  preferred_element_type=jnp.float32)     # (TN*L_out, C_out)

    # Single reshape to 3-D, then pool over the length axis.
    pooled = jnp.max(acc.reshape(tn, l_out, c_out), axis=1)   # (TN, C_out)

    # bias + ReLU after the max-pool (bias const over L, ReLU monotone => identical).
    pooled = jnp.maximum(pooled + b_ref[...], 0.0)

    if pack > 1:  # lane-dense store: (TN, C_out) -> (TN/pack, pack*C_out), same bytes
        pooled = pooled.reshape(tn // pack, pack * c_out)
    o_ref[...] = pooled.astype(o_ref.dtype)


def _choose_tile_n(n, target=256):
    """Largest divisor of n <= target, preferring >= 2 grid steps (v7x megacore)."""
    divisors = [d for d in range(1, n + 1) if n % d == 0 and d <= target]
    best = max(divisors)
    if n // best < 2:
        two_step = [d for d in divisors if n // d >= 2]
        if two_step:
            best = max(two_step)
    return best


def cnn_forward(x_reshaped, weight, bias, *, kernel_size=5, padding=1,
                tile_n=None, use_bf16=True):
    """x_reshaped: (S, B, C_in, L); weight: (C_out, C_in, K); bias: (C_out,)."""
    s, b, c_in, l = x_reshaped.shape
    c_out = weight.shape[0]
    k = kernel_size
    l_pad = l + 2 * padding
    l_out = l_pad - k + 1
    n = s * b

    if tile_n is None:
        tile_n = _choose_tile_n(n)
    assert n % tile_n == 0, "S*B must be a multiple of tile_n"

    # Lane-dense output packing: only when the block stays (8,128)-tileable.
    pack = 1
    if c_out < 128 and 128 % c_out == 0:
        cand = 128 // c_out
        if tile_n % (8 * cand) == 0:
            pack = cand

    in_dtype = jnp.bfloat16 if use_bf16 else jnp.float32

    # Host-side glue: flatten, channels-last, zero-pad the length axis.
    # TODO(synk): pad/transpose could be folded into the kernel (zero-masked edge taps)
    # to save one extra HBM pass over x for very large inputs.
    x = jnp.transpose(x_reshaped.reshape(n, c_in, l), (0, 2, 1))      # (N, L, C_in)
    x_pad = jnp.pad(x, ((0, 0), (padding, padding), (0, 0))).astype(in_dtype)

    # weight (C_out, C_in, K) -> (K, C_in, C_out) -> (K*C_in, C_out)
    w = jnp.transpose(weight, (2, 1, 0)).reshape(k * c_in, c_out).astype(in_dtype)
    bias_2d = bias.reshape(1, c_out).astype(jnp.float32)

    # VMEM budget (double-buffered inputs/outputs + f32 intermediates).
    ib = jnp.dtype(in_dtype).itemsize
    vmem_est = 2 * (tile_n * l_pad * c_in * ib + k * c_in * c_out * ib
                    + c_out * 4 + tile_n * c_out * 4)
    vmem_est += tile_n * l_out * (k * c_in + c_out) * 4
    compiler_kwargs = dict(dimension_semantics=("parallel",))
    if vmem_est > 32 * 1024 * 1024:
        # v7x has 64 MiB physical VMEM (vs 128 MiB on v5e/v6e); keep headroom.
        compiler_kwargs["vmem_limit_bytes"] = min(int(vmem_est * 2), 100 * 1024 * 1024)

    kern = functools.partial(_cnn_kernel, kernel_size=k, l_out=l_out, pack=pack)

    out = pl.pallas_call(
        kern,
        out_shape=jax.ShapeDtypeStruct((n // pack, pack * c_out), jnp.float32),
        grid_spec=pl.GridSpec(
            grid=(n // tile_n,),
            in_specs=[
                pl.BlockSpec((tile_n, l_pad, c_in), lambda i: (i, 0, 0)),
                pl.BlockSpec((k * c_in, c_out), lambda i: (0, 0)),
                pl.BlockSpec((1, c_out), lambda i: (0, 0)),
            ],
            out_specs=pl.BlockSpec((tile_n // pack, pack * c_out), lambda i: (i, 0)),
        ),
        compiler_params=pltpu.CompilerParams(**compiler_kwargs),
    )(x_pad, w, bias_2d)

    # (N/pack, pack*C_out) row-major == (N, C_out) row-major.
    return out.reshape(s, b, c_out)


def _reference(x_reshaped, weight, bias, *, kernel_size=5, padding=1):
    """Pure-JAX reference matching the PyTorch module."""
    s, b, c_in, l = x_reshaped.shape
    c_out = weight.shape[0]
    x = x_reshaped.reshape(s * b, c_in, l)
    x_pad = jnp.pad(x, ((0, 0), (0, 0), (padding, padding)))
    l_out = l + 2 * padding - kernel_size + 1
    cols = jnp.stack([x_pad[:, :, t:t + kernel_size] for t in range(l_out)], axis=1)
    conv = jnp.einsum("nlck,ock->nlo", cols, weight) + bias[None, None, :]
    pooled = jnp.max(jax.nn.relu(conv), axis=1)             # (N, C_out)
    return pooled.reshape(s, b, c_out)


if __name__ == "__main__":
    # Small shapes consistent with the module's forward signature.
    S, B = 8, 2                 # sentence_length, batch_size
    C_IN = 16                   # char_embedding_dim
    C_OUT = 32                  # word_embedding_dim
    L = 12                      # max_word_length
    K, PAD = 5, 1

    key = jax.random.PRNGKey(0)
    kx, kw, kb, kx2 = jax.random.split(key, 4)
    x = jax.random.normal(kx, (S, B, C_IN, L), dtype=jnp.float32)
    fan_in = C_IN * K
    weight = jax.random.normal(kw, (C_OUT, C_IN, K), dtype=jnp.float32) / jnp.sqrt(fan_in)
    bias = jax.random.normal(kb, (C_OUT,), dtype=jnp.float32) * 0.01

    ref = _reference(x, weight, bias, kernel_size=K, padding=PAD)

    # Exact-structure check with f32 MXU inputs.
    out_f32 = jax.block_until_ready(
        cnn_forward(x, weight, bias, kernel_size=K, padding=PAD, use_bf16=False))
    assert out_f32.shape == (S, B, C_OUT), out_f32.shape
    assert jnp.allclose(out_f32, ref, atol=1e-4, rtol=1e-4), "f32 mismatch vs reference"

    # Default (bf16 MXU inputs, f32 accumulation) — looser tolerance.
    out_bf16 = jax.block_until_ready(
        cnn_forward(x, weight, bias, kernel_size=K, padding=PAD))
    assert jnp.allclose(out_bf16, ref, atol=3e-2, rtol=3e-2), "bf16 mismatch vs reference"

    # Larger S*B exercises the lane-dense (packed, 128-wide) output store path.
    S2, B2 = 8, 8
    x2 = jax.random.normal(kx2, (S2, B2, C_IN, L), dtype=jnp.float32)
    ref2 = _reference(x2, weight, bias, kernel_size=K, padding=PAD)
    out2 = jax.block_until_ready(
        cnn_forward(x2, weight, bias, kernel_size=K, padding=PAD))
    assert out2.shape == (S2, B2, C_OUT), out2.shape
    assert jnp.allclose(out2, ref2, atol=3e-2, rtol=3e-2), "packed-path mismatch vs reference"

    print("KERNEL_OK")
</pallas_src>

<mosaic_0001>
module attributes {stable_mosaic.version = 11 : i64} {
  func.func @_cnn_kernel(%arg0: i32, %arg1: memref<8x14x16xf32, #tpu.memory_space<vmem>>, %arg2: memref<80x32xf32, #tpu.memory_space<vmem>>, %arg3: memref<1x32xf32, #tpu.memory_space<vmem>>, %arg4: memref<8x32xf32, #tpu.memory_space<vmem>>) attributes {dimension_semantics = [#tpu.dimension_semantics<parallel>], iteration_bounds = array<i64: 2>, scalar_prefetch = 0 : i64, scratch_operands = 0 : i64, tpu.core_type = #tpu.core_type<tc>, window_params = [{transform_indices = @transform_0, window_bounds = array<i64: 8, 14, 16>}, {pipeline_mode = #tpu.pipeline_mode<synchronous>, transform_indices = @transform_1, window_bounds = array<i64: 80, 32>}, {pipeline_mode = #tpu.pipeline_mode<synchronous>, transform_indices = @transform_2, window_bounds = array<i64: 1, 32>}, {transform_indices = @transform_3, window_bounds = array<i64: 8, 32>}]} {
    %c0 = arith.constant 0 : index
    %c0_0 = arith.constant 0 : index
    %c0_1 = arith.constant 0 : index
    %0 = vector.load %arg1[%c0, %c0_0, %c0_1] : memref<8x14x16xf32, #tpu.memory_space<vmem>>, vector<8x10x16xf32>
    %c0_2 = arith.constant 0 : index
    %c1 = arith.constant 1 : index
    %c0_3 = arith.constant 0 : index
    %1 = vector.load %arg1[%c0_2, %c1, %c0_3] : memref<8x14x16xf32, #tpu.memory_space<vmem>>, vector<8x10x16xf32>
    %c0_4 = arith.constant 0 : index
    %c2 = arith.constant 2 : index
    %c0_5 = arith.constant 0 : index
    %2 = vector.load %arg1[%c0_4, %c2, %c0_5] : memref<8x14x16xf32, #tpu.memory_space<vmem>>, vector<8x10x16xf32>
    %c0_6 = arith.constant 0 : index
    %c3 = arith.constant 3 : index
    %c0_7 = arith.constant 0 : index
    %3 = vector.load %arg1[%c0_6, %c3, %c0_7] : memref<8x14x16xf32, #tpu.memory_space<vmem>>, vector<8x10x16xf32>
    %c0_8 = arith.constant 0 : index
    %c4 = arith.constant 4 : index
    %c0_9 = arith.constant 0 : index
    %4 = vector.load %arg1[%c0_8, %c4, %c0_9] : memref<8x14x16xf32, #tpu.memory_space<vmem>>, vector<8x10x16xf32>
    %5 = tpu.concatenate %0, %1, %2, %3, %4 in 2 : vector<8x10x16xf32>, vector<8x10x16xf32>, vector<8x10x16xf32>, vector<8x10x16xf32>, vector<8x10x16xf32> -> vector<8x10x80xf32>
    %6 = vector.shape_cast %5 : vector<8x10x80xf32> to vector<80x80xf32>
    %c0_10 = arith.constant 0 : index
    %c0_11 = arith.constant 0 : index
    %7 = vector.load %arg2[%c0_10, %c0_11] : memref<80x32xf32, #tpu.memory_space<vmem>>, vector<80x32xf32>
    %cst = arith.constant dense<0.000000e+00> : vector<80x32xf32>
    %8 = tpu.matmul %6, %7, %cst {dimension_numbers = #tpu.dot_dimension_numbers<[1], [0], [0], [1], [0, 0, 1, 1], [], []>} : vector<80x80xf32>, vector<80x32xf32>, vector<80x32xf32> -> vector<80x32xf32>
    %9 = vector.shape_cast %8 : vector<80x32xf32> to vector<8x10x32xf32>
    %cst_12 = arith.constant dense<0xFF800000> : vector<8x32xf32>
    %10 = vector.multi_reduction <maximumf>, %9, %cst_12 [1] : vector<8x10x32xf32> to vector<8x32xf32>
    %c0_13 = arith.constant 0 : index
    %c0_14 = arith.constant 0 : index
    %11 = vector.load %arg3[%c0_13, %c0_14] : memref<1x32xf32, #tpu.memory_space<vmem>>, vector<1x32xf32>
    %12 = vector.broadcast %11 : vector<1x32xf32> to vector<8x32xf32>
    %13 = arith.addf %10, %12 : vector<8x32xf32>
    %cst_15 = arith.constant 0.000000e+00 : f32
    %14 = vector.broadcast %cst_15 : f32 to vector<8x32xf32>
    %15 = arith.maximumf %13, %14 : vector<8x32xf32>
    %c0_16 = arith.constant 0 : index
    %c0_17 = arith.constant 0 : index
    %16 = vector.load %arg4[%c0_16, %c0_17] : memref<8x32xf32, #tpu.memory_space<vmem>>, vector<8x32xf32>
    tpu.vector_store %arg4[%c0_16, %c0_17], %15 {strides = array<i32>} : memref<8x32xf32, #tpu.memory_space<vmem>>, vector<8x32xf32>,
    return
  }
  func.func @transform_0(%arg0: i32) -> (i32, i32, i32) {
    %c0_i32 = arith.constant 0 : i32
    %c0_i32_0 = arith.constant 0 : i32
    %c0_i32_1 = arith.constant 0 : i32
    return %arg0, %c0_i32, %c0_i32_0 : i32, i32, i32
  }
  func.func @transform_1(%arg0: i32) -> (i32, i32) {
    %c0_i32 = arith.constant 0 : i32
    %c0_i32_0 = arith.constant 0 : i32
    %c0_i32_1 = arith.constant 0 : i32
    return %c0_i32, %c0_i32_0 : i32, i32
  }
  func.func @transform_2(%arg0: i32) -> (i32, i32) {
    %c0_i32 = arith.constant 0 : i32
    %c0_i32_0 = arith.constant 0 : i32
    %c0_i32_1 = arith.constant 0 : i32
    return %c0_i32, %c0_i32_0 : i32, i32
  }
  func.func @transform_3(%arg0: i32) -> (i32, i32) {
    %c0_i32 = arith.constant 0 : i32
    %c0_i32_0 = arith.constant 0 : i32
    return %arg0, %c0_i32 : i32, i32
  }
}

</mosaic_0001>

<bundles_post_ra>
// kernel: tpu_custom_call.1
= control target key start
LH: loop header
LB: loop body
LE: loop exit
PB: predicated region body
PF: predicated region fallthrough
CT: control target
= control target key end

     0   :  { %8 = vsyncpa [#allocation3], 0  ;;  %s1620_s0 = inlined_call_operand.vmem [shape: f32[16,14,16], index: 0, kind: input, shape index: {}]   ;;  %s1621_s1 = inlined_call_operand.vmem [shape: f32[80,32], index: 1, kind: input, shape index: {}]   ;;  %s1622_s2 = inlined_call_operand.vmem [shape: f32[1,32], index: 2, kind: input, shape index: {}]   ;;  %s1623_s3 = inlined_call_operand.hbm [shape: f32[16,32], index: 3, kind: output, shape index: {}]  }
   0x1   :  { %10 = vsyncpa [#allocation3 + $0x1], 0  ;;  %s1253_s12 = smov 0   ;;  %s1255_s13 = smov 0  }
   0x2   :  { %s1257_s14 = smov 0   ;;  %s1259_s15 = smov 0  }
   0x3 LB: > { %s1067_s16 = sadd.s32 4294967295, %s1227_s15   ;;  %s1068_s17 = sadd.s32 4294967294, %s1227_s15   ;;  %s1227_s15 = sphi %s1259_s15, %s1629_s15   ;;  %s1223_s14 = sphi %s1257_s14, %s1628_s14   ;;  %s1219_s13 = sphi %s1255_s13, %s1627_s13   ;;  %s1215_s12 = sphi %s1253_s12, %s1626_s12  }
   0x4   : > { %s1276_s18 = sadd.s32 1, %s1227_s15   ;;  %s91_s19 = sadd.s32 1, %s1223_s14 }
   0x5   : > { %s88_s20 = ssub.s32 %s1227_s15, %s1276_s18  ;;  %p101_p0 = scmp.ne.s32.totalorder %s1223_s14, %s1219_s13 }
   0x6   : > { %p89_p1 = scmp.eq.s32.totalorder %s88_s20, 0  ;;  %p102_p2 = scmp.eq.s32.totalorder %s1067_s16, 1 }
   0x7   : > { %p107_p3 = scmp.ne.s32.totalorder %s1219_s13, %s1215_s12  ;;  %p108_p4 = scmp.eq.s32.totalorder %s1068_s17, 1 }
   0x8   : > { %s1286_s21 = scalar_select %p89_p1, %s1223_s14, %s91_s19  }
   0x9   : > { %p1288_p5 = por %p102_p2, %p101_p0  ;;  %p1292_p6 = por %p108_p4, %p107_p3 }
   0xa   : > { %p1071_p7 = scmp.ge.s32.totalorder %s1227_s15, 1  ;;  %p142_p8 = scmp.lt.s32.totalorder %s1227_s15, 3 }
   0xc   : > { %p143_p9 = pnand %p1071_p7, %p142_p8 }
   0xd   : > { %s1298_s24 = sshll.u32 (!%p143_p9), %s1067_s16, 3  ;;  %s1229_s30 = smov (!%p143_p9), 48  }
   0xe   : > { %146 = sbr.rel (%p143_p9) target bundleno = 486 (0x1e6), region = 32  ;;  %p168_p10 = scmp.lt.s32.totalorder (!%p143_p9), %s1298_s24, 15 }
   0xf   : > { %s1230_s4 = smov (!%p143_p9), 16   ;;  %s1231_s5 = smov (!%p143_p9), 64  }
  0x10   : > { %s1232_s6 = smov (!%p143_p9), 32   ;;  %s1004_s20 = scalar_lea.hbm (!%p143_p9), %s1623_s3, %s1298_s24 }
  0x11   : > { %s1008_s27 = sshll.u32 (!%p143_p9), %s1004_s20, 4  ;;  %s1185_s10 = scalar_lea.hbm (!%p143_p9), %s1623_s3, 16  ;;  %s1009_s27 = int_to_ptr.hbm [resolvable:$true] %s1008_s27 }
  0x12   : > { %s1179_s28 = sshra.s32 (!%p143_p9), %s1009_s27, 4  ;;  %s1180_s28 = int_to_ptr.hbm [resolvable:$true] %s1179_s28 }
  0x13   : > { %s169_s25 = scalar_select %p168_p10, %s1298_s24, 15  ;;  %v627_v33 = vld [vmem:[%s1621_s1 + $0x48] sm:$0xff]  ;;  %v626_v34 = vld [vmem:[%s1621_s1 + $0x40] sm:$0xff]  ;;  %v625_v38 = vld [vmem:[%s1621_s1 + $0x38] sm:$0xff]  ;;  %vm510_vm0 = vcmask 130048   ;;  %vm527_vm1 = vcmask 261120  }
  0x14   : > { %712 = vmatpush.msra.mxu0 %v627_v33  ;;  %1091 = vmatpush.msra.mxu1 %v627_v33  ;;  %v624_v40 = vld [vmem:[%s1621_s1 + $0x30] sm:$0xff]  ;;  %v623_v44 = vld [vmem:[%s1621_s1 + $0x28] sm:$0xff]  ;;  %v622_v45 = vld [vmem:[%s1621_s1 + $0x20] sm:$0xff]  ;;  %vm544_vm2 = vcmask 392192   ;;  %vm561_vm3 = vcmask 523264   ;;  %vm685_vm4 = vcmask 654336   ;;  %p1186_p0 = scmp.lt.s32.totalorder %s1180_s28, %s1623_s3 }
  0x15   : > { %s1090_s26 = sshll.u32 %s169_s25, 4  ;;  %1092 = vmatpush.msra.mxu2 %v627_v33  ;;  %1093 = vmatpush.msra.mxu3 %v627_v33  ;;  %v621_v46 = vld [vmem:[%s1621_s1 + $0x18] sm:$0xff]  ;;  %v620_v48 = vld [vmem:[%s1621_s1 + $0x10] sm:$0xff]  ;;  %v619_v52 = vld [vmem:[%s1621_s1 + $0x8] sm:$0xff]  ;;  %vm870_vm5 = vcmask 254976   ;;  %vm971_vm6 = vcmask 1041409  }
  0x16   : > { %s1305_s29 = scalar_lea.vmem %s1620_s0, %s1090_s26  ;;  %713 = vmatpush.msra.mxu0 %v626_v34  ;;  %1094 = vmatpush.msra.mxu1 %v626_v34  ;;  %v618_v54 = vld [vmem:[%s1621_s1] sm:$0xff]  ;;  %vm974_vm7 = vcmask 1042434   ;;  %vm977_vm8 = vcmask 1043459   ;;  %vm980_vm9 = vcmask 1044484   ;;  %vm983_vm10 = vcmask 1045509   ;;  %s1181_s7 = scalar_lea.hbm %s1180_s28, 8 }
  0x17   : > { %v222_v0 = vld [vmem:[%s1305_s29 + $0x3] sm:$0xff]  ;;  %v192_v2 = vld [vmem:[%s1305_s29 + $0x11] sm:$0xff]  ;;  %v223_v12 = vld [vmem:[%s1305_s29 + $0xb] sm:$0x3]  ;;  %1095 = vmatpush.msra.mxu2 %v626_v34  ;;  %1096 = vmatpush.msra.mxu3 %v626_v34  ;;  %vm986_vm11 = vcmask 1046534   ;;  %vm989_vm12 = vcmask 1047559   ;;  %p1182_p11 = scmp.ne.s32.totalorder %s1180_s28, %s1181_s7  ;;  %p1187_p1 = scmp.lt.s32.totalorder %s1185_s10, %s1181_s7 }
  0x18   : > { %v190_v1 = vld [vmem:[%s1305_s29 + $0x1] sm:$0xff]  ;;  %398 = vrot.lane.b32.xlu1 %v222_v0, %s1229_s30  ;;  %274 = vrot.lane.b32.xlu2 %v192_v2, %s1230_s4  ;;  %v208_v5 = vld [vmem:[%s1305_s29 + $0x12] sm:$0xff] }
  0x19   : > { %270 = vrot.lane.b32.xlu0 %v190_v1, %s1230_s4  ;;  %v238_v3 = vld [vmem:[%s1305_s29 + $0x4] sm:$0xff]  ;;  %v224_v8 = vld [vmem:[%s1305_s29 + $0x13] sm:$0xff]  ;;  %v239_v15 = vld [vmem:[%s1305_s29 + $0xc] sm:$0x3]  ;;  %714 = vmatpush.msra.mxu0 %v625_v38  ;;  %p1183_p12 = pnand %p1182_p11, %p1288_p5  ;;  %p1188_p2 = por %p1187_p1, %p1186_p0 }
  0x1a   : > { %v206_v4 = vld [vmem:[%s1305_s29 + $0x2] sm:$0xff]  ;;  %v207_v10 = vld [vmem:[%s1305_s29 + $0xa] sm:$0x3]  ;;  %v240_v11 = vld [vmem:[%s1305_s29 + $0x14] sm:$0xff]  ;;  %1097 = vmatpush.msra.mxu1 %v625_v38  ;;  %1098 = vmatpush.msra.mxu2 %v625_v38 }
  0x1b   : > { %v194_v6 = vld [vmem:[%s1305_s29 + $0x21] sm:$0xff]  ;;  %v191_v7 = vld [vmem:[%s1305_s29 + $0x9] sm:$0x3]  ;;  %v193_v13 = vld [vmem:[%s1305_s29 + $0x19] sm:$0x3]  ;;  %1099 = vmatpush.msra.mxu3 %v625_v38  ;;  %715 = vmatpush.msra.mxu0 %v624_v40  ;;  %p1184_p13 = pneg %p1183_p12 }
  0x1c   : > { %v210_v9 = vld [vmem:[%s1305_s29 + $0x22] sm:$0xff]  ;;  %v209_v16 = vld [vmem:[%s1305_s29 + $0x1a] sm:$0x3]  ;;  %v241_v18 = vld [vmem:[%s1305_s29 + $0x1c] sm:$0x3]  ;;  %1100 = vmatpush.msra.mxu1 %v624_v40  ;;  %1101 = vmatpush.msra.mxu2 %v624_v40 }
  0x1d   : > { %v226_v14 = vld [vmem:[%s1305_s29 + $0x23] sm:$0xff]  ;;  %v225_v19 = vld [vmem:[%s1305_s29 + $0x1b] sm:$0x3]  ;;  %v196_v20 = vld [vmem:[%s1305_s29 + $0x31] sm:$0xff]  ;;  %1102 = vmatpush.msra.mxu3 %v624_v40  ;;  %716 = vmatpush.msra.mxu0 %v623_v44  ;;  %p1189_p3 = pnand %p1188_p2, %p1184_p13 }
  0x1e   : > { %v242_v17 = vld [vmem:[%s1305_s29 + $0x24] sm:$0xff]  ;;  %v212_v22 = vld [vmem:[%s1305_s29 + $0x32] sm:$0xff]  ;;  %v213_v26 = vld [vmem:[%s1305_s29 + $0x3a] sm:$0x3]  ;;  %1103 = vmatpush.msra.mxu1 %v623_v44  ;;  %1104 = vmatpush.msra.mxu2 %v623_v44 }
  0x1f   : > { %v195_v21 = vld [vmem:[%s1305_s29 + $0x29] sm:$0x3]  ;;  %v197_v23 = vld [vmem:[%s1305_s29 + $0x39] sm:$0x3]  ;;  %v227_v27 = vld [vmem:[%s1305_s29 + $0x2b] sm:$0x3]  ;;  %717 = vmatpush.msra.mxu0 %v622_v45  ;;  %1105 = vmatpush.msra.mxu3 %v623_v44 }
  0x20   : > { %462 = vrot.lane.b32.xlu1 %v238_v3, %s1231_s5  ;;  %338 = vrot.lane.b32.xlu2 %v208_v5, %s1232_s6  ;;  %v211_v24 = vld [vmem:[%s1305_s29 + $0x2a] sm:$0x3]  ;;  %v228_v25 = vld [vmem:[%s1305_s29 + $0x33] sm:$0xff] }
  0x21   : > { %334 = vrot.lane.b32.xlu0 %v206_v4, %s1232_s6  ;;  %v244_v28 = vld [vmem:[%s1305_s29 + $0x34] sm:$0xff]  ;;  %v245_v30 = vld [vmem:[%s1305_s29 + $0x3c] sm:$0x3]  ;;  %v243_v31 = vld [vmem:[%s1305_s29 + $0x2c] sm:$0x3]  ;;  %1106 = vmatpush.msra.mxu1 %v622_v45 }
  0x22   : > { %v229_v29 = vld [vmem:[%s1305_s29 + $0x3b] sm:$0x3]  ;;  %v198_v32 = vld [vmem:[%s1305_s29 + $0x41] sm:$0xff]  ;;  %v216_v41 = vld [vmem:[%s1305_s29 + $0x52] sm:$0xff]  ;;  %718 = vmatpush.msra.mxu0 %v621_v46  ;;  %1107 = vmatpush.msra.mxu2 %v622_v45 }
  0x23   : > { %v230_v35 = vld [vmem:[%s1305_s29 + $0x43] sm:$0xff]  ;;  %v200_v42 = vld [vmem:[%s1305_s29 + $0x51] sm:$0xff]  ;;  %1109 = vmatpush.msra.mxu1 %v621_v46  ;;  %1108 = vmatpush.msra.mxu3 %v622_v45  ;;  %v247_v57 = vld [vmem:[%s1305_s29 + $0x4c] sm:$0x3] }
  0x24   : > { %v214_v36 = vld [vmem:[%s1305_s29 + $0x42] sm:$0xff]  ;;  %v215_v49 = vld [vmem:[%s1305_s29 + $0x4a] sm:$0x3]  ;;  %v232_v50 = vld [vmem:[%s1305_s29 + $0x53] sm:$0xff]  ;;  %719 = vmatpush.msra.mxu0 %v620_v48  ;;  %1110 = vmatpush.msra.mxu2 %v621_v46 }
  0x25   : > { %v246_v37 = vld [vmem:[%s1305_s29 + $0x44] sm:$0xff]  ;;  %v248_v51 = vld [vmem:[%s1305_s29 + $0x54] sm:$0xff]  ;;  %1112 = vmatpush.msra.mxu1 %v620_v48  ;;  %1111 = vmatpush.msra.mxu3 %v621_v46  ;;  %v251_v45 = vld [vmem:[%s1305_s29 + $0x6c] sm:$0x3] }
  0x26   : > { %v199_v43 = vld [vmem:[%s1305_s29 + $0x49] sm:$0x3]  ;;  %720 = vmatpush.msra.mxu0 %v619_v52  ;;  %v176_v53 = vld [vmem:[%s1305_s29 + $0x10] sm:$0xff]  ;;  %1113 = vmatpush.msra.mxu2 %v620_v48  ;;  %v231_v58 = vld [vmem:[%s1305_s29 + $0x4b] sm:$0x3] }
  0x27   : > { %1115 = vmatpush.msra.mxu1 %v619_v52  ;;  %1114 = vmatpush.msra.mxu3 %v620_v48  ;;  %v202_v60 = vld [vmem:[%s1305_s29 + $0x61] sm:$0xff]  ;;  %v201_v1 = vld [vmem:[%s1305_s29 + $0x59] sm:$0x3]  ;;  %v219_v38 = vld [vmem:[%s1305_s29 + $0x6a] sm:$0x3] }
  0x28   : > { %278 = vrot.lane.b32.xlu1 %v194_v6, %s1230_s4  ;;  %402 = vrot.lane.b32.xlu2 %v224_v8, %s1229_s30  ;;  %v218_v3 = vld [vmem:[%s1305_s29 + $0x62] sm:$0xff]  ;;  %v235_v40 = vld [vmem:[%s1305_s29 + $0x6b] sm:$0x3] }
  0x29   : > { %272 = vrot.lane.b32.xlu0 %v191_v7, %s1230_s4  ;;  %721 = vmatpush.msra.mxu0 %v618_v54  ;;  %v234_v6 = vld [vmem:[%s1305_s29 + $0x63] sm:$0xff]  ;;  %v236_v46 = vld [vmem:[%s1305_s29 + $0x73] sm:$0xff] }
  0x2a   : > { %1118 = vmatpush.msra.mxu1 %v618_v54  ;;  %1116 = vmatpush.msra.mxu2 %v619_v52  ;;  %v174_v7 = vld [vmem:[%s1305_s29] sm:$0xff]  ;;  %v175_v44 = vld [vmem:[%s1305_s29 + $0x8] sm:$0x3] }
  0x2b   : > { %1117 = vmatpush.msra.mxu3 %v619_v52 }
  0x2c   : > { %1119 = vmatpush.msra.mxu2 %v618_v54 }
  0x2d   : > { %1120 = vmatpush.msra.mxu3 %v618_v54  ;;  %v205_v54 = vld [vmem:[%s1305_s29 + $0x79] sm:$0x3] }
  0x30   : > { %342 = vrot.lane.b32.xlu1 %v210_v9, %s1232_s6  ;;  %466 = vrot.lane.b32.xlu2 %v240_v11, %s1231_s5 }
  0x31   : > { %336 = vrot.lane.b32.xlu0 %v207_v10, %s1232_s6 }
  0x38   : > { %400 = vrot.lane.b32.xlu1 %v223_v12, %s1229_s30  ;;  %406 = vrot.lane.b32.xlu2 %v226_v14, %s1229_s30 }
  0x39   : > { %276 = vrot.lane.b32.xlu0 %v193_v13, %s1230_s4 }
  0x40   : > { %464 = vrot.lane.b32.xlu1 %v239_v15, %s1231_s5  ;;  %470 = vrot.lane.b32.xlu2 %v242_v17, %s1231_s5  ;;  %v250_v15 = vld [vmem:[%s1305_s29 + $0x64] sm:$0xff]  ;;  %v233_v17 = vld [vmem:[%s1305_s29 + $0x5b] sm:$0x3] }
  0x41   : > { %340 = vrot.lane.b32.xlu0 %v209_v16, %s1232_s6  ;;  %v217_v16 = vld [vmem:[%s1305_s29 + $0x5a] sm:$0x3] }
  0x48   : > { %468 = vrot.lane.b32.xlu1 %v241_v18, %s1231_s5  ;;  %282 = vrot.lane.b32.xlu2 %v196_v20, %s1230_s4 }
  0x49   : > { %404 = vrot.lane.b32.xlu0 %v225_v19, %s1229_s30 }
  0x50   : > { %280 = vrot.lane.b32.xlu1 %v195_v21, %s1230_s4  ;;  %284 = vrot.lane.b32.xlu2 %v197_v23, %s1230_s4 }
  0x51   : > { %346 = vrot.lane.b32.xlu0 %v212_v22, %s1232_s6 }
  0x58   : > { %344 = vrot.lane.b32.xlu1 %v211_v24, %s1232_s6  ;;  %348 = vrot.lane.b32.xlu2 %v213_v26, %s1232_s6  ;;  %v178_v24 = vld [vmem:[%s1305_s29 + $0x20] sm:$0xff]  ;;  %v249_v26 = vld [vmem:[%s1305_s29 + $0x5c] sm:$0x3] }
  0x59   : > { %410 = vrot.lane.b32.xlu0 %v228_v25, %s1229_s30  ;;  %v203_v25 = vld [vmem:[%s1305_s29 + $0x69] sm:$0x3] }
  0x60   : > { %408 = vrot.lane.b32.xlu1 %v227_v27, %s1229_s30  ;;  %412 = vrot.lane.b32.xlu2 %v229_v29, %s1229_s30  ;;  %v204_v27 = vld [vmem:[%s1305_s29 + $0x71] sm:$0xff] }
  0x61   : > { %474 = vrot.lane.b32.xlu0 %v244_v28, %s1231_s5 }
  0x68   : > { %476 = vrot.lane.b32.xlu1 %v245_v30, %s1231_s5  ;;  %286 = vrot.lane.b32.xlu2 %v198_v32, %s1230_s4 }
  0x69   : > { %472 = vrot.lane.b32.xlu0 %v243_v31, %s1231_s5 }
  0x70   : > { %414 = vrot.lane.b32.xlu1 %v230_v35, %s1229_s30  ;;  %478 = vrot.lane.b32.xlu2 %v246_v37, %s1231_s5  ;;  %v220_v37 = vld [vmem:[%s1305_s29 + $0x72] sm:$0xff] }
  0x71   : > { %350 = vrot.lane.b32.xlu0 %v214_v36, %s1232_s6 }
  0x72   : > { %v275_v39 = vpop.permute.xlu2 %274 }
  0x73   : > { %v513_v55 = vsel %vm510_vm0, %v176_v53, %v275_v39 }
  0x78   : > { %354 = vrot.lane.b32.xlu1 %v216_v41, %s1232_s6  ;;  %288 = vrot.lane.b32.xlu2 %v199_v43, %s1230_s4 }
  0x79   : > { %290 = vrot.lane.b32.xlu0 %v200_v42, %s1230_s4 }
  0x7a   : > { %v339_v47 = vpop.permute.xlu2 %338 }
  0x7b   : > { %v530_v59 = vsel %vm527_vm1, %v513_v55, %v339_v47  ;;  %v252_v47 = vld [vmem:[%s1305_s29 + $0x74] sm:$0xff] }
  0x7c   : > { %v221_v55 = vld [vmem:[%s1305_s29 + $0x7a] sm:$0x3] }
  0x80   : > { %352 = vrot.lane.b32.xlu1 %v215_v49, %s1232_s6  ;;  %482 = vrot.lane.b32.xlu2 %v248_v51, %s1231_s5 }
  0x81   : > { %418 = vrot.lane.b32.xlu0 %v232_v50, %s1229_s30 }
  0x82   : > { %v403_v56 = vpop.permute.xlu2 %402 }
  0x83   : > { %v547_v61 = vsel %vm544_vm2, %v530_v59, %v403_v56 }
  0x88   : > { %480 = vrot.lane.b32.xlu1 %v247_v57, %s1231_s5  ;;  %294 = vrot.lane.b32.xlu2 %v202_v60, %s1230_s4  ;;  %v177_v57 = vld [vmem:[%s1305_s29 + $0x18] sm:$0x3] }
  0x89   : > { %416 = vrot.lane.b32.xlu0 %v231_v58, %s1229_s30  ;;  %v237_v58 = vld [vmem:[%s1305_s29 + $0x7b] sm:$0x3] }
  0x8a   : > { %v399_v62 = vpop.permute.xlu1 %398  ;;  %v467_v0 = vpop.permute.xlu2 %466 }
  0x8b   : > { %v271_v63 = vpop.permute.xlu0 %270  ;;  %v564_v2 = vsel %vm561_vm3, %v547_v61, %v467_v0 }
  0x8c   : > { %v597_v4 = vrot.slane %v564_v2, 2  ;;  %v598_v5 = vrot.slane %v564_v2, 4  ;;  %638 = vst [vmem:[#allocation1 + $0x21] ss:$4 sm:$0xff] %v564_v2  ;;  %v511_v8 = vsel %vm510_vm0, %v174_v7, %v271_v63  ;;  %v599_v28 = vrot.slane %v564_v2, 6 }
  0x8e   : > { %640 = vst [vmem:[#allocation1 + $0x22] ss:$4 sm:$0xff] %v597_v4  ;;  %v253_v4 = vld [vmem:[%s1305_s29 + $0x7c] sm:$0x3] }
  0x8f   : > { %642 = vst [vmem:[#allocation1 + $0x23] ss:$4 sm:$0xff] %v598_v5 }
  0x90   : > { %292 = vrot.lane.b32.xlu1 %v201_v1, %s1230_s4  ;;  %422 = vrot.lane.b32.xlu2 %v234_v6, %s1229_s30 }
  0x91   : > { %358 = vrot.lane.b32.xlu0 %v218_v3, %s1232_s6 }
  0x92   : > { %v463_v9 = vpop.permute.xlu1 %462  ;;  %v407_v12 = vpop.permute.xlu2 %406 }
  0x93   : > { %v335_v10 = vpop.permute.xlu0 %334 }
  0x94   : > { %v528_v11 = vsel %vm527_vm1, %v511_v8, %v335_v10 }
  0x95   : > { %v545_v13 = vsel %vm544_vm2, %v528_v11, %v399_v62 }
  0x96   : > { %v562_v14 = vsel %vm561_vm3, %v545_v13, %v463_v9 }
  0x97   : > { %v594_v18 = vrot.slane %v562_v14, 2  ;;  %v595_v19 = vrot.slane %v562_v14, 4  ;;  %v596_v20 = vrot.slane %v562_v14, 6  ;;  %628 = vst [vmem:[#allocation1] ss:$4 sm:$0xff] %v562_v14 }
  0x98   : > { %486 = vrot.lane.b32.xlu1 %v250_v15, %s1231_s5  ;;  %420 = vrot.lane.b32.xlu2 %v233_v17, %s1229_s30  ;;  %v181_v14 = vld [vmem:[%s1305_s29 + $0x38] sm:$0x3] }
  0x99   : > { %630 = vst [vmem:[#allocation1 + $0x1] ss:$4 sm:$0xff] %v594_v18  ;;  %356 = vrot.lane.b32.xlu0 %v217_v16, %s1232_s6 }
  0x9a   : > { %632 = vst [vmem:[#allocation1 + $0x2] ss:$4 sm:$0xff] %v595_v19  ;;  %v279_v21 = vpop.permute.xlu1 %278  ;;  %v471_v23 = vpop.permute.xlu2 %470 }
  0x9b   : > { %634 = vst [vmem:[#allocation1 + $0x3] ss:$4 sm:$0xff] %v596_v20  ;;  %v273_v22 = vpop.permute.xlu0 %272  ;;  %v515_v29 = vsel %vm510_vm0, %v178_v24, %v279_v21  ;;  %v179_v20 = vld [vmem:[%s1305_s29 + $0x28] sm:$0x3] }
  0x9c   : > { %v512_v48 = vsel %vm510_vm0, %v175_v44, %v273_v22 }
  0xa0   : > { %296 = vrot.lane.b32.xlu1 %v203_v25, %s1230_s4  ;;  %298 = vrot.lane.b32.xlu2 %v204_v27, %s1230_s4 }
  0xa1   : > { %484 = vrot.lane.b32.xlu0 %v249_v26, %s1231_s5 }
  0xa2   : > { %v643_v30 = vld.sshfl [vmem:[#allocation1] sm:$0xff pattern:$0x73625140]  ;;  %v343_v31 = vpop.permute.xlu1 %342  ;;  %v283_v34 = vpop.permute.xlu2 %282 }
  0xa3   : > { %645 = vst [vmem:[#allocation1] ss:$4 sm:$0xff] %v599_v28  ;;  %1076 = vmatmul.msk.f32.vlgmr.msra.gmra.mxu0 %vm685_vm4, %v643_v30  ;;  %v337_v32 = vpop.permute.xlu0 %336  ;;  %v532_v33 = vsel %vm527_vm1, %v515_v29, %v343_v31 }
  0xa4   : > { %v549_v35 = vsel %vm544_vm2, %v532_v33, %v407_v12  ;;  %v529_v49 = vsel %vm527_vm1, %v512_v48, %v337_v32  ;;  %v180_v12 = vld [vmem:[%s1305_s29 + $0x30] sm:$0xff] }
  0xa5   : > { %v566_v36 = vsel %vm561_vm3, %v549_v35, %v471_v23  ;;  %v517_v13 = vsel %vm510_vm0, %v180_v12, %v283_v34 }
  0xa6   : > { %v600_v39 = vrot.slane %v566_v36, 2  ;;  %647 = vst [vmem:[#allocation1 + $0x2] ss:$4 sm:$0xff] %v566_v36  ;;  %v601_v60 = vrot.slane %v566_v36, 4  ;;  %v602_v0 = vrot.slane %v566_v36, 6  ;;  %v182_v36 = vld [vmem:[%s1305_s29 + $0x40] sm:$0xff] }
  0xa8   : > { %648 = vst [vmem:[#allocation1 + $0x3] ss:$4 sm:$0xff] %v600_v39  ;;  %362 = vrot.lane.b32.xlu1 %v220_v37, %s1232_s6  ;;  %424 = vrot.lane.b32.xlu2 %v235_v40, %s1229_s30 }
  0xa9   : > { %360 = vrot.lane.b32.xlu0 %v219_v38, %s1232_s6 }
  0xaa   : > { %v401_v41 = vpop.permute.xlu1 %400  ;;  %v285_v43 = vpop.permute.xlu2 %284 }
  0xab   : > { %v277_v42 = vpop.permute.xlu0 %276  ;;  %v546_v50 = vsel %vm544_vm2, %v529_v49, %v401_v41  ;;  %v518_v22 = vsel %vm510_vm0, %v181_v14, %v285_v43  ;;  %v185_v14 = vld [vmem:[%s1305_s29 + $0x58] sm:$0x3] }
  0xac   : > { %v514_v59 = vsel %vm510_vm0, %v177_v57, %v277_v42 }
  0xb0   : > { %488 = vrot.lane.b32.xlu1 %v251_v45, %s1231_s5  ;;  %490 = vrot.lane.b32.xlu2 %v252_v47, %s1231_s5 }
  0xb1   : > { %426 = vrot.lane.b32.xlu0 %v236_v46, %s1229_s30 }
  0xb2   : > { %v465_v51 = vpop.permute.xlu1 %464  ;;  %v349_v56 = vpop.permute.xlu2 %348 }
  0xb3   : > { %v341_v52 = vpop.permute.xlu0 %340  ;;  %v563_v53 = vsel %vm561_vm3, %v546_v50, %v465_v51  ;;  %v535_v27 = vsel %vm527_vm1, %v518_v22, %v349_v56  ;;  %v184_v51 = vld [vmem:[%s1305_s29 + $0x50] sm:$0xff] }
  0xb4   : > { %636 = vst [vmem:[#allocation1 + $0x20] ss:$4 sm:$0xff] %v563_v53  ;;  %v531_v61 = vsel %vm527_vm1, %v514_v59, %v341_v52  ;;  %v183_v59 = vld [vmem:[%s1305_s29 + $0x48] sm:$0x3] }
  0xb8   : > { %364 = vrot.lane.b32.xlu1 %v221_v55, %s1232_s6  ;;  %428 = vrot.lane.b32.xlu2 %v237_v58, %s1229_s30 }
  0xb9   : > { %300 = vrot.lane.b32.xlu0 %v205_v54, %s1230_s4  ;;  %s164_s4 = sand.u32 1, %s1219_s13  }
  0xba   : > { %v469_v62 = vpop.permute.xlu1 %468  ;;  %v413_v5 = vpop.permute.xlu2 %412  ;;  %s994_s24 = scalar_lea.sflag [#allocation3], %s164_s4 }
  0xbb   : > { %v405_v63 = vpop.permute.xlu0 %404  ;;  %v644_v1 = vld.sshfl [vmem:[#allocation1 + $0x20] sm:$0xff pattern:$0x73625140]  ;;  %v552_v29 = vsel %vm544_vm2, %v535_v27, %v413_v5 }
  0xbc   : > { %v548_v2 = vsel %vm544_vm2, %v531_v61, %v405_v63  ;;  %649 = vst [vmem:[#allocation1 + $0x20] ss:$4 sm:$0xff] %v601_v60  ;;  %1077 = vmatmul.msk.f32.gmra.mxu0 %vm685_vm4, %v644_v1 }
  0xbd   : > { %v565_v3 = vsel %vm561_vm3, %v548_v2, %v469_v62  ;;  %650 = vst [vmem:[#allocation1 + $0x21] ss:$4 sm:$0xff] %v602_v0 }
  0xbe   : > { %646 = vst [vmem:[#allocation1 + $0x1] ss:$4 sm:$0xff] %v565_v3 }
  0xc1   : > { %492 = vrot.lane.b32.xlu0 %v253_v4, %s1231_s5  ;;  %s1583_s5 = sshll.u32 %s164_s4, 3 }
  0xc2   : > { %v281_v6 = vpop.permute.xlu1 %280  ;;  %v287_v9 = vpop.permute.xlu2 %286  ;;  %s166_s25 = scalar_lea.vmem [#allocation2], %s1583_s5 }
  0xc3   : > { %v347_v7 = vpop.permute.xlu0 %346  ;;  %v516_v26 = vsel %vm510_vm0, %v179_v20, %v281_v6  ;;  %v519_v37 = vsel %vm510_vm0, %v182_v36, %v287_v9  ;;  %s1006_s26 = sshll.u32 %s166_s25, 4  ;;  %s1007_s26 = int_to_ptr.vmem [resolvable:$true] %s1006_s26 }
  0xc4   : > { %v534_v15 = vsel %vm527_vm1, %v517_v13, %v347_v7  ;;  %v186_v7 = vld [vmem:[%s1305_s29 + $0x60] sm:$0xff] }
  0xc5   : > { %v653_v8 = vld.sshfl [vmem:[#allocation1] sm:$0xff pattern:$0x73625140] }
  0xc6   : > { %1078 = vmatmul.msk.f32.vlgmr.msra.gmra.mxu1 %vm685_vm4, %v653_v8 }
  0xca   : > { %v345_v10 = vpop.permute.xlu1 %344  ;;  %v479_v16 = vpop.permute.xlu2 %478 }
  0xcb   : > { %v411_v11 = vpop.permute.xlu0 %410  ;;  %v533_v28 = vsel %vm527_vm1, %v516_v26, %v345_v10 }
  0xcc   : > { %v551_v17 = vsel %vm544_vm2, %v534_v15, %v411_v11 }
  0xd2   : > { %v409_v18 = vpop.permute.xlu1 %408  ;;  %v289_v35 = vpop.permute.xlu2 %288 }
  0xd3   : > { %v475_v19 = vpop.permute.xlu0 %474  ;;  %v550_v30 = vsel %vm544_vm2, %v533_v28, %v409_v18  ;;  %v520_v0 = vsel %vm510_vm0, %v183_v59, %v289_v35  ;;  %v188_v35 = vld [vmem:[%s1305_s29 + $0x70] sm:$0xff] }
  0xd4   : > { %v568_v21 = vsel %vm561_vm3, %v551_v17, %v475_v19 }
  0xd5   : > { %v603_v23 = vrot.slane %v568_v21, 2  ;;  %v604_v24 = vrot.slane %v568_v21, 4  ;;  %v605_v25 = vrot.slane %v568_v21, 6  ;;  %652 = vst [vmem:[#allocation1 + $0x23] ss:$4 sm:$0xff] %v568_v21 }
  0xd7   : > { %655 = vst [vmem:[#allocation1] ss:$4 sm:$0xff] %v603_v23 }
  0xd8   : > { %656 = vst [vmem:[#allocation1 + $0x1] ss:$4 sm:$0xff] %v604_v24 }
  0xd9   : > { %657 = vst [vmem:[#allocation1 + $0x2] ss:$4 sm:$0xff] %v605_v25 }
  0xda   : > { %v477_v31 = vpop.permute.xlu1 %476  ;;  %v483_v45 = vpop.permute.xlu2 %482 }
  0xdb   : > { %v473_v32 = vpop.permute.xlu0 %472  ;;  %v569_v33 = vsel %vm561_vm3, %v552_v29, %v477_v31 }
  0xdc   : > { %v567_v34 = vsel %vm561_vm3, %v550_v30, %v473_v32  ;;  %658 = vst [vmem:[#allocation1 + $0x3] ss:$4 sm:$0xff] %v569_v33  ;;  %v187_v30 = vld [vmem:[%s1305_s29 + $0x68] sm:$0x3] }
  0xdd   : > { %651 = vst [vmem:[#allocation1 + $0x22] ss:$4 sm:$0xff] %v567_v34 }
  0xe2   : > { %v415_v38 = vpop.permute.xlu1 %414  ;;  %v295_v53 = vpop.permute.xlu2 %294 }
  0xe3   : > { %v351_v39 = vpop.permute.xlu0 %350  ;;  %v663_v40 = vld.sshfl [vmem:[#allocation1] sm:$0xff pattern:$0x73625140]  ;;  %v523_v12 = vsel %vm510_vm0, %v186_v7, %v295_v53 }
  0xe4   : > { %v536_v41 = vsel %vm527_vm1, %v519_v37, %v351_v39  ;;  %v654_v43 = vld.sshfl [vmem:[#allocation1 + $0x20] sm:$0xff pattern:$0x73625140]  ;;  %1080 = vmatmul.msk.f32.vlgmr.msra.gmra.mxu2 %vm685_vm4, %v663_v40 }
  0xe5   : > { %v553_v42 = vsel %vm544_vm2, %v536_v41, %v415_v38  ;;  %1079 = vmatmul.msk.f32.gmra.mxu1 %vm685_vm4, %v654_v43 }
  0xe6   : > { %v570_v44 = vsel %vm561_vm3, %v553_v42, %v479_v16 }
  0xe7   : > { %v606_v46 = vrot.slane %v570_v44, 2  ;;  %v607_v47 = vrot.slane %v570_v44, 4  ;;  %v608_v48 = vrot.slane %v570_v44, 6  ;;  %659 = vst [vmem:[#allocation1 + $0x20] ss:$4 sm:$0xff] %v570_v44 }
  0xe9   : > { %660 = vst [vmem:[#allocation1 + $0x21] ss:$4 sm:$0xff] %v606_v46 }
  0xea   : > { %661 = vst [vmem:[#allocation1 + $0x22] ss:$4 sm:$0xff] %v607_v47  ;;  %v355_v49 = vpop.permute.xlu1 %354  ;;  %v423_v1 = vpop.permute.xlu2 %422 }
  0xeb   : > { %662 = vst [vmem:[#allocation1 + $0x23] ss:$4 sm:$0xff] %v608_v48  ;;  %v291_v50 = vpop.permute.xlu0 %290 }
  0xec   : > { %v521_v52 = vsel %vm510_vm0, %v184_v51, %v291_v50  ;;  %v189_v50 = vld [vmem:[%s1305_s29 + $0x78] sm:$0x3] }
  0xed   : > { %v538_v57 = vsel %vm527_vm1, %v521_v52, %v355_v49 }
  0xf2   : > { %v664_v54 = vld.sshfl [vmem:[#allocation1 + $0x20] sm:$0xff pattern:$0x73625140]  ;;  %v353_v55 = vpop.permute.xlu1 %352  ;;  %v421_v10 = vpop.permute.xlu2 %420 }
  0xf3   : > { %1081 = vmatmul.msk.f32.gmra.mxu2 %vm685_vm4, %v664_v54  ;;  %v419_v56 = vpop.permute.xlu0 %418  ;;  %v537_v2 = vsel %vm527_vm1, %v520_v0, %v353_v55 }
  0xf4   : > { %v555_v58 = vsel %vm544_vm2, %v538_v57, %v419_v56 }
  0xf5   : > { %v572_v60 = vsel %vm561_vm3, %v555_v58, %v483_v45 }
  0xf6   : > { %v609_v61 = vrot.slane %v572_v60, 2  ;;  %v610_v62 = vrot.slane %v572_v60, 4  ;;  %v611_v63 = vrot.slane %v572_v60, 6  ;;  %666 = vst [vmem:[#allocation1 + $0x1] ss:$4 sm:$0xff] %v572_v60 }
  0xf8   : > { %667 = vst [vmem:[#allocation1 + $0x2] ss:$4 sm:$0xff] %v609_v61 }
  0xf9   : > { %668 = vst [vmem:[#allocation1 + $0x3] ss:$4 sm:$0xff] %v610_v62 }
  0xfa   : > { %669 = vst [vmem:[#allocation1 + $0x20] ss:$4 sm:$0xff] %v611_v63  ;;  %v481_v3 = vpop.permute.xlu1 %480  ;;  %v299_v23 = vpop.permute.xlu2 %298 }
  0xfb   : > { %v417_v4 = vpop.permute.xlu0 %416  ;;  %v525_v36 = vsel %vm510_vm0, %v188_v35, %v299_v23 }
  0xfc   : > { %v554_v5 = vsel %vm544_vm2, %v537_v2, %v417_v4 }
  0xfd   : > { %v571_v6 = vsel %vm561_vm3, %v554_v5, %v481_v3 }
  0xfe   : > { %665 = vst [vmem:[#allocation1] ss:$4 sm:$0xff] %v571_v6 }
 0x102   : > { %v293_v8 = vpop.permute.xlu1 %292  ;;  %v425_v29 = vpop.permute.xlu2 %424 }
 0x103   : > { %v359_v9 = vpop.permute.xlu0 %358  ;;  %v522_v19 = vsel %vm510_vm0, %v185_v14, %v293_v8 }
 0x104   : > { %v540_v13 = vsel %vm527_vm1, %v523_v12, %v359_v9 }
 0x105   : > { %v673_v11 = vld.sshfl [vmem:[#allocation1] sm:$0xff pattern:$0x73625140]  ;;  %v557_v15 = vsel %vm544_vm2, %v540_v13, %v423_v1 }
 0x106   : > { %1082 = vmatmul.msk.f32.gmra.mxu2 %vm685_vm4, %v673_v11 }
 0x10a   : > { %v487_v16 = vpop.permute.xlu1 %486  ;;  %v491_v38 = vpop.permute.xlu2 %490 }
 0x10b   : > { %v357_v17 = vpop.permute.xlu0 %356  ;;  %v574_v18 = vsel %vm561_vm3, %v557_v15, %v487_v16 }
 0x10c   : > { %v612_v20 = vrot.slane %v574_v18, 2  ;;  %v613_v21 = vrot.slane %v574_v18, 4  ;;  %v614_v22 = vrot.slane %v574_v18, 6  ;;  %671 = vst [vmem:[#allocation1 + $0x22] ss:$4 sm:$0xff] %v574_v18  ;;  %v539_v24 = vsel %vm527_vm1, %v522_v19, %v357_v17 }
 0x10d   : > { %v556_v25 = vsel %vm544_vm2, %v539_v24, %v421_v10 }
 0x10e   : > { %672 = vst [vmem:[#allocation1 + $0x23] ss:$4 sm:$0xff] %v612_v20 }
 0x10f   : > { %675 = vst [vmem:[#allocation1] ss:$4 sm:$0xff] %v613_v21 }
 0x110   : > { %676 = vst [vmem:[#allocation1 + $0x1] ss:$4 sm:$0xff] %v614_v22 }
 0x112   : > { %v297_v26 = vpop.permute.xlu1 %296  ;;  %v429_v59 = vpop.permute.xlu2 %428 }
 0x113   : > { %v485_v27 = vpop.permute.xlu0 %484  ;;  %v524_v34 = vsel %vm510_vm0, %v187_v30, %v297_v26 }
 0x114   : > { %v573_v28 = vsel %vm561_vm3, %v556_v25, %v485_v27 }
 0x115   : > { %670 = vst [vmem:[#allocation1 + $0x21] ss:$4 sm:$0xff] %v573_v28 }
 0x11a   : > { %v363_v31 = vpop.permute.xlu1 %362 }
 0x11b   : > { %v361_v32 = vpop.permute.xlu0 %360  ;;  %v542_v39 = vsel %vm527_vm1, %v525_v36, %v363_v31 }
 0x11c   : > { %v674_v33 = vld.sshfl [vmem:[#allocation1 + $0x20] sm:$0xff pattern:$0x73625140]  ;;  %v541_v37 = vsel %vm527_vm1, %v524_v34, %v361_v32 }
 0x11d   : > { %1083 = vmatmul.msk.f32.vlgmr.msra.gmra.mxu3 %vm685_vm4, %v674_v33  ;;  %v558_v40 = vsel %vm544_vm2, %v541_v37, %v425_v29 }
 0x120   : > { %v723_v49 = vpop.f32.mrf.mxu0 }
 0x121   : > { %v763_v52 = vrot.slane %v723_v49, 2  ;;  %v764_v56 = vrot.slane %v723_v49, 4  ;;  %v765_v57 = vrot.slane %v723_v49, 6 }
 0x122   : > { %v489_v41 = vpop.permute.xlu1 %488 }
 0x123   : > { %v427_v42 = vpop.permute.xlu0 %426  ;;  %v575_v43 = vsel %vm561_vm3, %v558_v40, %v489_v41 }
 0x124   : > { %v559_v44 = vsel %vm544_vm2, %v542_v39, %v427_v42  ;;  %677 = vst [vmem:[#allocation1 + $0x2] ss:$4 sm:$0xff] %v575_v43 }
 0x125   : > { %v576_v45 = vsel %vm561_vm3, %v559_v44, %v491_v38 }
 0x126   : > { %v615_v46 = vrot.slane %v576_v45, 2  ;;  %v616_v47 = vrot.slane %v576_v45, 4  ;;  %v617_v48 = vrot.slane %v576_v45, 6  ;;  %678 = vst [vmem:[#allocation1 + $0x3] ss:$4 sm:$0xff] %v576_v45 }
 0x128   : > { %679 = vst [vmem:[#allocation1 + $0x20] ss:$4 sm:$0xff] %v615_v46 }
 0x129   : > { %680 = vst [vmem:[#allocation1 + $0x21] ss:$4 sm:$0xff] %v616_v47 }
 0x12a   : > { %681 = vst [vmem:[#allocation1 + $0x22] ss:$4 sm:$0xff] %v617_v48  ;;  %v365_v55 = vpop.permute.xlu1 %364 }
 0x12b   : > { %v301_v51 = vpop.permute.xlu0 %300 }
 0x12c   : > { %v526_v54 = vsel %vm510_vm0, %v189_v50, %v301_v51 }
 0x12d   : > { %v683_v53 = vld.sshfl [vmem:[#allocation1] sm:$0xff pattern:$0x73625140]  ;;  %v543_v58 = vsel %vm527_vm1, %v526_v54, %v365_v55 }
 0x12e   : > { %793 = vst [vmem:[#allocation1] ss:$4 sm:$0xff] %v723_v49  ;;  %1084 = vmatmul.msk.f32.gmra.mxu3 %vm685_vm4, %v683_v53  ;;  %v560_v60 = vsel %vm544_vm2, %v543_v58, %v429_v59 }
 0x12f   : > { %795 = vst [vmem:[#allocation1 + $0x1] ss:$4 sm:$0xff] %v763_v52 }
 0x130   : > { %797 = vst [vmem:[#allocation1 + $0x2] ss:$4 sm:$0xff] %v764_v56 }
 0x131   : > { %799 = vst [vmem:[#allocation1 + $0x3] ss:$4 sm:$0xff] %v765_v57 }
 0x133   : > { %v493_v61 = vpop.permute.xlu0 %492 }
 0x134   : > { %v577_v62 = vsel %vm561_vm3, %v560_v60, %v493_v61 }
 0x135   : > { %682 = vst [vmem:[#allocation1 + $0x23] ss:$4 sm:$0xff] %v577_v62 }
 0x138   : > { %v1554_v4 = vld.sshfl [vmem:[#allocation1] sm:$0xff pattern:$0x73625140] }
 0x139   : > { %v726_v63 = vpop.f32.mrf.mxu0  ;;  %v869_v60 = vsel %vm527_vm1, %v1554_v4, -inf }
 0x13a   : > { %v766_v0 = vrot.slane %v726_v63, 2  ;;  %v767_v1 = vrot.slane %v726_v63, 4  ;;  %v768_v3 = vrot.slane %v726_v63, 6 }
 0x13c   : > { %v684_v2 = vld.sshfl [vmem:[#allocation1 + $0x20] sm:$0xff pattern:$0x73625140]  ;;  %804 = vst [vmem:[#allocation1] ss:$4 sm:$0xff] %v766_v0 }
 0x13d   : > { %801 = vst [vmem:[#allocation1 + $0x20] ss:$4 sm:$0xff] %v726_v63  ;;  %1085 = vmatmul.msk.f32.gmra.mxu3 %vm685_vm4, %v684_v2 }
 0x13e   : > { %805 = vst [vmem:[#allocation1 + $0x1] ss:$4 sm:$0xff] %v767_v1 }
 0x13f   : > { %806 = vst [vmem:[#allocation1 + $0x2] ss:$4 sm:$0xff] %v768_v3 }
 0x143   : > { %v729_v6 = vpop.f32.mrf.mxu1 }
 0x144   : > { %v1557_v5 = vld.sshfl [vmem:[#allocation1 + $0x20] sm:$0xff pattern:$0x73625140]  ;;  %v769_v7 = vrot.slane %v729_v6, 2  ;;  %807 = vst [vmem:[#allocation1 + $0x3] ss:$4 sm:$0xff] %v729_v6 }
 0x145   : > { %v770_v8 = vrot.slane %v729_v6, 4  ;;  %v771_v9 = vrot.slane %v729_v6, 6  ;;  %v871_v56 = vsel %vm870_vm5, %v1557_v5, -inf }
 0x146   : > { %808 = vst [vmem:[#allocation1 + $0x20] ss:$4 sm:$0xff] %v769_v7  ;;  %v872_v63 = vmax.f32 %v869_v60, %v871_v56 }
 0x14b   : > { %v809_v10 = vld.sshfl [vmem:[#allocation1] sm:$0xff pattern:$0x73625140] }
 0x14c   : > { %811 = vst [vmem:[#allocation1] ss:$4 sm:$0xff] %v770_v8  ;;  %v879_v46 = vsel %vm527_vm1, %v809_v10, -inf  ;;  %v873_v10 = vrot.slane %v872_v63, 4 }
 0x14d   : > { %812 = vst [vmem:[#allocation1 + $0x1] ss:$4 sm:$0xff] %v771_v9  ;;  %v810_v14 = vld.sshfl [vmem:[#allocation1 + $0x20] sm:$0xff pattern:$0x73625140] }
 0x14e   : > { %v880_v41 = vsel %vm870_vm5, %v810_v14, -inf }
 0x14f   : > { %v881_v49 = vmax.f32 %v879_v46, %v880_v41 }
 0x151   : > { %v882_v59 = vrot.slane %v881_v49, 4 }
 0x153   : > { %v883_v7 = vmax.f32 %v881_v49, %v882_v59 }
 0x155   : > { %v884_v14 = vrot.slane %v883_v7, 2 }
 0x162   : > { %v732_v11 = vpop.f32.mrf.mxu1 }
 0x163   : > { %v772_v12 = vrot.slane %v732_v11, 2  ;;  %v773_v13 = vrot.slane %v732_v11, 4  ;;  %813 = vst [vmem:[#allocation1 + $0x2] ss:$4 sm:$0xff] %v732_v11  ;;  %v774_v16 = vrot.slane %v732_v11, 6 }
 0x165   : > { %814 = vst [vmem:[#allocation1 + $0x3] ss:$4 sm:$0xff] %v772_v12 }
 0x166   : > { %815 = vst [vmem:[#allocation1 + $0x20] ss:$4 sm:$0xff] %v773_v13 }
 0x167   : > { %v735_v15 = vpop.f32.mrf.mxu2 }
 0x168   : > { %v775_v18 = vrot.slane %v735_v15, 2  ;;  %v776_v19 = vrot.slane %v735_v15, 4  ;;  %v777_v21 = vrot.slane %v735_v15, 6 }
 0x16c   : > { %v816_v17 = vld.sshfl [vmem:[#allocation1] sm:$0xff pattern:$0x73625140] }
 0x16d   : > { %818 = vst [vmem:[#allocation1] ss:$4 sm:$0xff] %v774_v16  ;;  %v817_v20 = vld.sshfl [vmem:[#allocation1 + $0x20] sm:$0xff pattern:$0x73625140]  ;;  %v888_v44 = vsel %vm527_vm1, %v816_v17, -inf }
 0x16e   : > { %819 = vst [vmem:[#allocation1 + $0x1] ss:$4 sm:$0xff] %v735_v15  ;;  %v889_v45 = vsel %vm870_vm5, %v817_v20, -inf }
 0x16f   : > { %820 = vst [vmem:[#allocation1 + $0x2] ss:$4 sm:$0xff] %v775_v18  ;;  %v890_v52 = vmax.f32 %v888_v44, %v889_v45 }
 0x170   : > { %821 = vst [vmem:[#allocation1 + $0x3] ss:$4 sm:$0xff] %v776_v19 }
 0x171   : > { %822 = vst [vmem:[#allocation1 + $0x20] ss:$4 sm:$0xff] %v777_v21  ;;  %v891_v61 = vrot.slane %v890_v52, 4  ;;  %v874_v21 = vmax.f32 %v872_v63, %v873_v10 }
 0x173   : > { %v892_v9 = vmax.f32 %v890_v52, %v891_v61 }
 0x175   : > { %v893_v20 = vrot.slane %v892_v9, 2 }
 0x176   : > { %v738_v22 = vpop.f32.mrf.mxu2 }
 0x177   : > { %v778_v23 = vrot.slane %v738_v22, 2  ;;  %v779_v24 = vrot.slane %v738_v22, 4  ;;  %v823_v25 = vld.sshfl [vmem:[#allocation1] sm:$0xff pattern:$0x73625140]  ;;  %v780_v26 = vrot.slane %v738_v22, 6 }
 0x178   : > { %825 = vst [vmem:[#allocation1] ss:$4 sm:$0xff] %v738_v22  ;;  %v824_v28 = vld.sshfl [vmem:[#allocation1 + $0x20] sm:$0xff pattern:$0x73625140]  ;;  %v897_v47 = vsel %vm527_vm1, %v823_v25, -inf  ;;  %v885_v25 = vmax.f32 %v883_v7, %v884_v14 }
 0x179   : > { %826 = vst [vmem:[#allocation1 + $0x1] ss:$4 sm:$0xff] %v778_v23  ;;  %v898_v48 = vsel %vm870_vm5, %v824_v28, -inf }
 0x17a   : > { %827 = vst [vmem:[#allocation1 + $0x2] ss:$4 sm:$0xff] %v779_v24  ;;  %v899_v53 = vmax.f32 %v897_v47, %v898_v48 }
 0x17b   : > { %828 = vst [vmem:[#allocation1 + $0x3] ss:$4 sm:$0xff] %v780_v26 }
 0x17c   : > { %v900_v0 = vrot.slane %v899_v53, 4 }
 0x17e   : > { %v901_v11 = vmax.f32 %v899_v53, %v900_v0 }
 0x180   : > { %v902_v22 = vrot.slane %v901_v11, 2 }
 0x182   : > { %v830_v32 = vld.sshfl [vmem:[#allocation1] sm:$0xff pattern:$0x73625140] }
 0x183   : > { %v906_v54 = vsel %vm527_vm1, %v830_v32, -inf  ;;  %v886_v32 = vrot.slane %v885_v25, 1 }
 0x185   : > { %v887_v41 = vmax.f32 %v885_v25, %v886_v32 }
 0x189   : > { %v741_v27 = vpop.f32.mrf.mxu2 }
 0x18a   : > { %v781_v29 = vrot.slane %v741_v27, 2  ;;  %v782_v30 = vrot.slane %v741_v27, 4  ;;  %v783_v31 = vrot.slane %v741_v27, 6  ;;  %829 = vst [vmem:[#allocation1 + $0x20] ss:$4 sm:$0xff] %v741_v27  ;;  %v894_v27 = vmax.f32 %v892_v9, %v893_v20 }
 0x18c   : > { %832 = vst [vmem:[#allocation1] ss:$4 sm:$0xff] %v781_v29  ;;  %v875_v29 = vrot.slane %v874_v21, 2 }
 0x18d   : > { %833 = vst [vmem:[#allocation1 + $0x1] ss:$4 sm:$0xff] %v782_v30  ;;  %v903_v30 = vmax.f32 %v901_v11, %v902_v22 }
 0x18e   : > { %834 = vst [vmem:[#allocation1 + $0x2] ss:$4 sm:$0xff] %v783_v31 }
 0x191   : > { %v831_v35 = vld.sshfl [vmem:[#allocation1 + $0x20] sm:$0xff pattern:$0x73625140] }
 0x192   : > { %v907_v50 = vsel %vm870_vm5, %v831_v35, -inf }
 0x193   : > { %v908_v57 = vmax.f32 %v906_v54, %v907_v50  ;;  %v1164_v50 = vld [vmem:[%s1622_s2] ss:$0 sm:$0xff] }
 0x194   : > { %v947_v54 = vadd.f32 %v1164_v50, %v887_v41 }
 0x195   : > { %v909_v2 = vrot.slane %v908_v57, 4 }
 0x196   : > { %v955_v63 = vmax.f32 %v947_v54, 0.0 }
 0x197   : > { %v910_v13 = vmax.f32 %v908_v57, %v909_v2 }
 0x199   : > { %v911_v24 = vrot.slane %v910_v13, 2 }
 0x19b   : > { %v912_v31 = vmax.f32 %v910_v13, %v911_v24 }
 0x1a0   : > { %v744_v33 = vpop.f32.mrf.mxu3 }
 0x1a1   : > { %v784_v34 = vrot.slane %v744_v33, 2  ;;  %835 = vst [vmem:[#allocation1 + $0x3] ss:$4 sm:$0xff] %v744_v33  ;;  %v785_v36 = vrot.slane %v744_v33, 4  ;;  %v786_v37 = vrot.slane %v744_v33, 6 }
 0x1a3   : > { %836 = vst [vmem:[#allocation1 + $0x20] ss:$4 sm:$0xff] %v784_v34  ;;  %v895_v34 = vrot.slane %v894_v27, 1 }
 0x1a5   : > { %v896_v44 = vmax.f32 %v894_v27, %v895_v34 }
 0x1a7   : > { %v948_v56 = vadd.f32 %v1164_v50, %v896_v44 }
 0x1a8   : > { %v837_v38 = vld.sshfl [vmem:[#allocation1] sm:$0xff pattern:$0x73625140] }
 0x1a9   : > { %839 = vst [vmem:[#allocation1] ss:$4 sm:$0xff] %v785_v36  ;;  %v915_v55 = vsel %vm527_vm1, %v837_v38, -inf  ;;  %v876_v36 = vmax.f32 %v874_v21, %v875_v29 }
 0x1aa   : > { %840 = vst [vmem:[#allocation1 + $0x1] ss:$4 sm:$0xff] %v786_v37  ;;  %v838_v40 = vld.sshfl [vmem:[#allocation1 + $0x20] sm:$0xff pattern:$0x73625140]  ;;  %v904_v37 = vrot.slane %v903_v30, 1 }
 0x1ab   : > { %v916_v51 = vsel %vm870_vm5, %v838_v40, -inf  ;;  %v877_v47 = vrot.slane %v876_v36, 1 }
 0x1ac   : > { %v917_v58 = vmax.f32 %v915_v55, %v916_v51  ;;  %v905_v48 = vmax.f32 %v903_v30, %v904_v37 }
 0x1ad   : > { %v878_v57 = vmax.f32 %v876_v36, %v877_v47 }
 0x1ae   : > { %v918_v3 = vrot.slane %v917_v58, 4  ;;  %v949_v59 = vadd.f32 %v1164_v50, %v905_v48 }
 0x1b0   : > { %v919_v15 = vmax.f32 %v917_v58, %v918_v3  ;;  %v946_v3 = vadd.f32 %v1164_v50, %v878_v57 }
 0x1b1   : > { %v747_v39 = vpop.f32.mrf.mxu3 }
 0x1b2   : > { %v787_v42 = vrot.slane %v747_v39, 2  ;;  %v788_v43 = vrot.slane %v747_v39, 4  ;;  %841 = vst [vmem:[#allocation1 + $0x2] ss:$4 sm:$0xff] %v747_v39  ;;  %v789_v62 = vrot.slane %v747_v39, 6  ;;  %v920_v26 = vrot.slane %v919_v15, 2 }
 0x1b3   : > { %v913_v39 = vrot.slane %v912_v31, 1  ;;  %v954_v13 = vmax.f32 %v946_v3, 0.0 }
 0x1b4   : > { %842 = vst [vmem:[#allocation1 + $0x3] ss:$4 sm:$0xff] %v787_v42  ;;  %v921_v33 = vmax.f32 %v919_v15, %v920_v26 }
 0x1b5   : > { %843 = vst [vmem:[#allocation1 + $0x20] ss:$4 sm:$0xff] %v788_v43  ;;  %v914_v51 = vmax.f32 %v912_v31, %v913_v39 }
 0x1b6   : > { %v922_v42 = vrot.slane %v921_v33, 1 }
 0x1b7   : > { %v950_v60 = vadd.f32 %v1164_v50, %v914_v51 }
 0x1b8   : > { %v923_v52 = vmax.f32 %v921_v33, %v922_v42 }
 0x1b9   : > { %v958_v7 = vmax.f32 %v950_v60, 0.0 }
 0x1bb   : > { %v844_v1 = vld.sshfl [vmem:[#allocation1] sm:$0xff pattern:$0x73625140]  ;;  %v979_v14 = vrot.slane %v958_v7, 4 }
 0x1bc   : > { %v845_v6 = vld.sshfl [vmem:[#allocation1 + $0x20] sm:$0xff pattern:$0x73625140]  ;;  %846 = vst [vmem:[#allocation1] ss:$4 sm:$0xff] %v789_v62  ;;  %v924_v8 = vsel %vm527_vm1, %v844_v1, -inf  ;;  %v951_v62 = vadd.f32 %v1164_v50, %v923_v52 }
 0x1bd   : > { %v925_v5 = vsel %vm870_vm5, %v845_v6, -inf  ;;  %v956_v1 = vmax.f32 %v948_v56, 0.0  ;;  %v957_v6 = vmax.f32 %v949_v59, 0.0 }
 0x1be   : > { %v926_v12 = vmax.f32 %v924_v8, %v925_v5  ;;  %v959_v9 = vmax.f32 %v951_v62, 0.0  ;;  %v970_v5 = vrot.slane %v955_v63, 7 }
 0x1bf   : > { %v973_v11 = vrot.slane %v956_v1, 6 }
 0x1c0   : > { %v750_v4 = vpop.f32.mrf.mxu3  ;;  %v927_v16 = vrot.slane %v926_v12, 4 }
 0x1c1   : > { %v790_v17 = vrot.slane %v750_v4, 2  ;;  %v791_v18 = vrot.slane %v750_v4, 4  ;;  %v792_v19 = vrot.slane %v750_v4, 6  ;;  %847 = vst [vmem:[#allocation1 + $0x1] ss:$4 sm:$0xff] %v750_v4  ;;  %v976_v4 = vrot.slane %v957_v6, 5 }
 0x1c2   : > { %v928_v23 = vmax.f32 %v926_v12, %v927_v16  ;;  %v972_v16 = vsel %vm971_vm6, %v970_v5, %v954_v13 }
 0x1c3   : > { %848 = vst [vmem:[#allocation1 + $0x2] ss:$4 sm:$0xff] %v790_v17  ;;  %v982_v17 = vrot.slane %v959_v9, 3 }
 0x1c4   : > { %849 = vst [vmem:[#allocation1 + $0x3] ss:$4 sm:$0xff] %v791_v18  ;;  %v929_v28 = vrot.slane %v928_v23, 2  ;;  %v975_v18 = vsel %vm974_vm7, %v973_v11, %v972_v16 }
 0x1c5   : > { %850 = vst [vmem:[#allocation1 + $0x20] ss:$4 sm:$0xff] %v792_v19  ;;  %v978_v21 = vsel %vm977_vm8, %v976_v4, %v975_v18 }
 0x1c6   : > { %v930_v35 = vmax.f32 %v928_v23, %v929_v28  ;;  %v981_v22 = vsel %vm980_vm9, %v979_v14, %v978_v21 }
 0x1c7   : > { %v984_v23 = vsel %vm983_vm10, %v982_v17, %v981_v22 }
 0x1c8   : > { %v931_v45 = vrot.slane %v930_v35, 1 }
 0x1ca   : > { %v932_v55 = vmax.f32 %v930_v35, %v931_v45 }
 0x1cb   : > { %v851_v38 = vld.sshfl [vmem:[#allocation1] sm:$0xff pattern:$0x73625140] }
 0x1cc   : > { %v852_v40 = vld.sshfl [vmem:[#allocation1 + $0x20] sm:$0xff pattern:$0x73625140]  ;;  %v933_v43 = vsel %vm527_vm1, %v851_v38, -inf  ;;  %v952_v0 = vadd.f32 %v1164_v50, %v932_v55 }
 0x1cd   : > { %v934_v46 = vsel %vm870_vm5, %v852_v40, -inf }
 0x1ce   : > { %v935_v49 = vmax.f32 %v933_v43, %v934_v46  ;;  %v960_v10 = vmax.f32 %v952_v0, 0.0 }
 0x1d0   : > { %v936_v53 = vrot.slane %v935_v49, 4  ;;  %v985_v19 = vrot.slane %v960_v10, 2 }
 0x1d2   : > { %v937_v58 = vmax.f32 %v935_v49, %v936_v53  ;;  %v987_v25 = vsel %vm986_vm11, %v985_v19, %v984_v23 }
 0x1d4   : > { %v938_v61 = vrot.slane %v937_v58, 2 }
 0x1d6   : > { %v939_v2 = vmax.f32 %v937_v58, %v938_v61 }
 0x1d8   : > { %v940_v8 = vrot.slane %v939_v2, 1 }
 0x1da   : > { %v941_v12 = vmax.f32 %v939_v2, %v940_v8 }
 0x1dc   : > { %v953_v15 = vadd.f32 %v1164_v50, %v941_v12 }
 0x1de   : > { %v961_v20 = vmax.f32 %v953_v15, 0.0 }
 0x1e0   : > { %v988_v24 = vrot.slane %v961_v20, 1 }
 0x1e2   : > { %v990_v26 = vsel %vm989_vm12, %v988_v24, %v987_v25 }
 0x1e3   : > { %992 = vst.msk [vmem:[%s166_s25] sm:$0xff] %vm527_vm1, %v990_v26 }
 0x1e4   : > { %1192 = shalt.err (!%p1189_p3)
}
 0x1e5   : > { %1121 = dma.vmem_to_hbm [thread:$0]  (%p1288_p5), %s1007_s26, 128, %s1009_s27, %s994_s24  }
 0x1e6 PF: > { %p1127_p4 = scmp.ge.s32.totalorder %s1227_s15, 2  ;;  %s1020_s17 = sand.u32 1, %s1215_s12  }
 0x1e7   : > { %s1021_s29 = scalar_lea.sflag [#allocation3], %s1020_s17 }
 0x1e8   : > { %p1124_p7 = pnand %p1127_p4, %p1292_p6 }
 0x1ea   : > { %p1125_p8 = pneg %p1124_p7 }
 0x1ec   : > { %1210 = dma.done.wait (%p1125_p8), %s1021_s29, 128  }
 0x1ed   : > { %1212 = vsyncadd (%p1125_p8), %s1021_s29, 4294967168  ;;  %p13_p9 = scmp.ge.s32.totalorder %s1276_s18, 4   ;;  %s1626_s12 = smov %s1219_s13 }
 0x1ee   : > { %s1627_s13 = smov %s1223_s14  ;;  %s1628_s14 = smov %s1286_s21 }
 0x1ef   : > { %s1629_s15 = smov %s1276_s18  ;;  %15 = sbr.rel (!%p13_p9) target bundleno = 3 (0x3), region = 78 }
 0x1f4   :  { %1027 = vsyncpa [#allocation3], 1 }
 0x1f5   :  { %1029 = vsyncpa [#allocation3 + $0x1], 1 }

</bundles_post_ra>
